<compile_context>
chip_gen: v6e
topology: v6e:2x2x1
jax: 0.10.0
libtpu: 0.0.40
codegen_flags: <defaults>
</compile_context>

<pallas_src>
import functools

import jax
import jax.numpy as jnp
from jax import lax
from jax.experimental import pallas as pl
from jax.experimental.pallas import tpu as pltpu


def _round_up(x, m):
    return (x + m - 1) // m * m


def _compute_row(xb, w, *, n_taps, compute_dtype):
    """One batch row: circular conv as a single depth-(K*C_in) MXU matmul.

    xb: (C_in, L) tile value, w: (C_out, K*C_in) folded weight value.
    Returns (C_out, L) float32.
    """
    c_in, L = xb.shape
    pad = n_taps // 2
    lane_aligned = (L % 128 == 0)
    if xb.dtype != compute_dtype:
        xb = xb.astype(compute_dtype)          # cast on the VMEM tile (review #6)
    taps = []
    for t in range(n_taps):
        # Tap t reads x[:, (l + t - pad) mod L] == roll(x, shift=pad - t, axis=1).
        s = (pad - t) % L
        if s == 0:
            taps.append(xb)
        elif lane_aligned:
            taps.append(pltpu.roll(xb, shift=s, axis=1))     # XLU lane rotate
        else:
            # TODO(synk): wrap-pad L to the next multiple of 128 in the wrapper
            # (or halo-tile) instead of unaligned lane slices + masked stores.
            taps.append(jnp.concatenate([xb[:, L - s:], xb[:, :L - s]], axis=1))
    xs = jnp.concatenate(taps, axis=0)                        # (K*C_in, L)
    # One MXU matmul per row, contraction depth K*C_in, f32 accumulation.
    return jnp.dot(w, xs, preferred_element_type=jnp.float32)


def _circular_conv1d_kernel(x_ref, w_ref, o_ref, *, n_taps, compute_dtype):
    # x_ref: (B_t, C_in, L), w_ref: (C_out, K*C_in), o_ref: (B_t, C_out, L)
    b_t = x_ref.shape[0]
    w = w_ref[...]
    row = functools.partial(_compute_row, w=w, n_taps=n_taps,
                            compute_dtype=compute_dtype)

    # TODO(synk): fold all batch rows into one batched dot_general (hoisting the
    # rolls/concat to the whole (B_t, C_in, L) block).  The kernel is HBM-bound
    # at these channel counts, so the per-row XLU/MXU/store work rides on idle
    # slots, and the per-row form keeps every op on proven rank-2 paths.
    if b_t <= 8:
        # Tiny tiles: static unroll, no loop overhead.
        for b in range(b_t):
            o_ref[b] = row(x_ref[b]).astype(o_ref.dtype)
    else:
        # Fat tiles: fori_loop bounds code size and vreg live ranges (review #9).
        def body(b, carry):
            o_ref[b] = row(x_ref[b]).astype(o_ref.dtype)
            return carry
        lax.fori_loop(0, b_t, body, 0, unroll=2)


def _vmem_capacity_bytes():
    # Per-core VMEM: v5e/v6e 128 MiB, v7x 64 MiB.  Fall back to the smallest
    # (v7x) figure if the query is unavailable.
    try:
        return int(pltpu.get_tpu_info().vmem_capacity_bytes)
    except Exception:
        return 64 * 1024 * 1024


def _pick_batch_tile(n, hbm_bytes_per_row, vmem_bytes_per_row, vmem_row_budget):
    """Largest divisor of n that moves ~1 MiB of in+out HBM bytes per grid
    step, subject to the VMEM budget and to keeping >= 4 grid steps when n
    allows it (>= 2 pipelined steps per v7x TensorCore)."""
    target_step_bytes = 1 << 20
    cap = max(1, target_step_bytes // max(1, hbm_bytes_per_row))
    cap = min(cap, max(1, vmem_row_budget // max(1, vmem_bytes_per_row)))
    if n >= 2:
        cap = min(cap, max(1, n // 4))
    cap = max(1, min(cap, n))
    # TODO(synk): allow a ragged last block instead of requiring an exact
    # divisor (prime n currently degrades to 1 row/step -- correct but slow).
    for bt in range(cap, 0, -1):
        if n % bt == 0:
            return bt
    return 1


def circular_conv1d(x, weight, *, batch_tile=None, compute_dtype=None):
    """Circular 1D convolution == CircularConv1d forward (bias=False).

    x: (N, C_in, L), weight: (C_out, C_in, K) -> (N, C_out, L), with the
    module's default circular padding of K // 2 on each side (odd K).
    compute_dtype: optional MXU operand dtype (e.g. jnp.bfloat16); the cast is
    applied to the VMEM tile inside the kernel (no extra HBM pass), the
    accumulation stays float32 and the output keeps x.dtype.
    """
    N, c_in, L = x.shape
    c_out, c_in_w, K = weight.shape
    assert c_in == c_in_w, "weight C_in mismatch"
    assert K % 2 == 1, "default CircularConv1d padding keeps L only for odd K"
    assert K // 2 <= L, "circular padding requires K//2 <= L"

    compute_dtype = jnp.dtype(x.dtype if compute_dtype is None else compute_dtype)

    # Weight-only preprocessing (tiny): fold the tap axis into the contraction
    # axis, w2[co, t*C_in + ci] = weight[co, ci, t].
    w2 = jnp.transpose(weight, (0, 2, 1)).reshape(c_out, K * c_in)
    w2 = w2.astype(compute_dtype)

    # --- byte-based tile sizing + VMEM budget (reviews #1/#2/#8) -----------
    x_item = jnp.dtype(x.dtype).itemsize
    c_item = compute_dtype.itemsize
    hbm_bytes_per_row = (c_in + c_out) * L * x_item          # in + out HBM bytes/row
    # VMEM per row: double-buffered, sublane-padded input + output tiles.
    vmem_bytes_per_row = 2 * (_round_up(c_in, 8) + _round_up(c_out, 8)) * L * x_item
    # Working set that does not scale with the tile (one row in flight).
    row_scratch = (_round_up(K * c_in, 8) * L * c_item        # K-stacked taps
                   + _round_up(c_out, 8) * L * 4)             # f32 accumulator
    weight_bytes = 2 * _round_up(c_out, 8) * _round_up(K * c_in, 128) * c_item

    vmem_budget = _vmem_capacity_bytes() // 2   # never request more than half
    row_budget = max(vmem_bytes_per_row,
                     vmem_budget - row_scratch - weight_bytes - (1 << 20))

    if batch_tile is None:
        batch_tile = _pick_batch_tile(N, hbm_bytes_per_row,
                                      vmem_bytes_per_row, row_budget)
    assert N % batch_tile == 0, "batch_tile must divide N"

    est = batch_tile * vmem_bytes_per_row + row_scratch + weight_bytes + (1 << 20)
    vmem_limit = int(min(vmem_budget, max(16 * 1024 * 1024, (3 * est) // 2)))

    kernel = functools.partial(_circular_conv1d_kernel, n_taps=K,
                               compute_dtype=compute_dtype)

    return pl.pallas_call(
        kernel,
        out_shape=jax.ShapeDtypeStruct((N, c_out, L), x.dtype),
        grid_spec=pltpu.PrefetchScalarGridSpec(
            num_scalar_prefetch=0,
            grid=(N // batch_tile,),
            in_specs=[
                pl.BlockSpec((batch_tile, c_in, L), lambda n: (n, 0, 0)),
                pl.BlockSpec((c_out, K * c_in), lambda n: (0, 0)),
            ],
            out_specs=pl.BlockSpec((batch_tile, c_out, L), lambda n: (n, 0, 0)),
        ),
        compiler_params=pltpu.CompilerParams(
            dimension_semantics=("parallel",),
            vmem_limit_bytes=vmem_limit,
        ),
    )(x, w2)


def _reference(x, weight):
    K = weight.shape[-1]
    pad = K // 2
    x_pad = jnp.pad(x, ((0, 0), (0, 0), (pad, pad)), mode="wrap")
    return jax.lax.conv_general_dilated(
        x_pad, weight,
        window_strides=(1,),
        padding="VALID",
        dimension_numbers=("NCH", "OIH", "NCH"),
        precision=jax.lax.Precision.HIGHEST,
    )


if __name__ == "__main__":
    # Small shapes consistent with the module: batch=2, channels=4, K=5,
    # L=128 periodic grid points (lane-dense spatial axis).
    N, C_IN, C_OUT, L, K = 2, 4, 4, 128, 5

    key = jax.random.PRNGKey(0)
    kx, kw = jax.random.split(key)
    x = jax.random.normal(kx, (N, C_IN, L), dtype=jnp.float32)
    # Fixed, non-trainable "coeffs" in PyTorch Conv1d weight layout.
    weight = jax.random.normal(kw, (C_OUT, C_IN, K), dtype=jnp.float32) * 0.1

    # 1) f32 path (matches the PyTorch module's numerics); auto batch tile.
    out = jax.block_until_ready(circular_conv1d(x, weight))
    ref = _reference(x, weight)
    assert out.shape == (N, C_OUT, L)
    assert jnp.allclose(out, ref, atol=1e-5, rtol=1e-5), "f32 mismatch vs reference"

    # 2) bf16 MXU operands (tile cast happens in VMEM inside the kernel).
    out_bf = jax.block_until_ready(
        circular_conv1d(x, weight, compute_dtype=jnp.bfloat16))
    ref_bf = _reference(
        x.astype(jnp.bfloat16).astype(jnp.float32),
        weight.astype(jnp.bfloat16).astype(jnp.float32))
    assert jnp.allclose(out_bf, ref_bf, atol=1e-3, rtol=1e-3), "bf16 mismatch vs reference"

    # 3) Fat batch tile -> exercises the fori_loop (review #9) path.
    x_big = jax.random.normal(jax.random.PRNGKey(1), (32, C_IN, L), dtype=jnp.float32)
    out_big = jax.block_until_ready(circular_conv1d(x_big, weight, batch_tile=16))
    ref_big = _reference(x_big, weight)
    assert jnp.allclose(out_big, ref_big, atol=1e-5, rtol=1e-5), "fat-tile mismatch"

    print("KERNEL_OK")
</pallas_src>

<mosaic_0001>
module attributes {stable_mosaic.version = 11 : i64} {
  func.func @_circular_conv1d_kernel(%arg0: i32, %arg1: memref<1x4x128xf32, #tpu.memory_space<vmem>>, %arg2: memref<4x20xf32, #tpu.memory_space<vmem>>, %arg3: memref<1x4x128xf32, #tpu.memory_space<vmem>>) attributes {dimension_semantics = [#tpu.dimension_semantics<parallel>], iteration_bounds = array<i64: 2>, scalar_prefetch = 0 : i64, scratch_operands = 0 : i64, tpu.core_type = #tpu.core_type<tc>, window_params = [{transform_indices = @transform_0, window_bounds = array<i64: 1, 4, 128>}, {pipeline_mode = #tpu.pipeline_mode<synchronous>, transform_indices = @transform_1, window_bounds = array<i64: 4, 20>}, {transform_indices = @transform_2, window_bounds = array<i64: 1, 4, 128>}]} {
    %c0 = arith.constant 0 : index
    %c0_0 = arith.constant 0 : index
    %0 = vector.load %arg2[%c0, %c0_0] : memref<4x20xf32, #tpu.memory_space<vmem>>, vector<4x20xf32>
    %c0_1 = arith.constant 0 : index
    %c0_2 = arith.constant 0 : index
    %c0_3 = arith.constant 0 : index
    %1 = vector.load %arg1[%c0_1, %c0_2, %c0_3] : memref<1x4x128xf32, #tpu.memory_space<vmem>>, vector<1x4x128xf32>
    %2 = vector.shape_cast %1 : vector<1x4x128xf32> to vector<4x128xf32>
    %c2_i32 = arith.constant 2 : i32
    %3 = tpu.dynamic_rotate %2 by %c2_i32 dim 1 : vector<4x128xf32>, i32 -> vector<4x128xf32>
    %c1_i32 = arith.constant 1 : i32
    %4 = tpu.dynamic_rotate %2 by %c1_i32 dim 1 : vector<4x128xf32>, i32 -> vector<4x128xf32>
    %c127_i32 = arith.constant 127 : i32
    %5 = tpu.dynamic_rotate %2 by %c127_i32 dim 1 : vector<4x128xf32>, i32 -> vector<4x128xf32>
    %c126_i32 = arith.constant 126 : i32
    %6 = tpu.dynamic_rotate %2 by %c126_i32 dim 1 : vector<4x128xf32>, i32 -> vector<4x128xf32>
    %7 = tpu.concatenate %3, %4, %2, %5, %6 in 0 : vector<4x128xf32>, vector<4x128xf32>, vector<4x128xf32>, vector<4x128xf32>, vector<4x128xf32> -> vector<20x128xf32>
    %cst = arith.constant dense<0.000000e+00> : vector<4x128xf32>
    %8 = tpu.matmul %0, %7, %cst {dimension_numbers = #tpu.dot_dimension_numbers<[1], [0], [0], [1], [0, 0, 1, 1], [], []>} : vector<4x20xf32>, vector<20x128xf32>, vector<4x128xf32> -> vector<4x128xf32>
    %c0_4 = arith.constant 0 : index
    %c0_5 = arith.constant 0 : index
    %c0_6 = arith.constant 0 : index
    %9 = vector.load %arg3[%c0_4, %c0_5, %c0_6] : memref<1x4x128xf32, #tpu.memory_space<vmem>>, vector<1x4x128xf32>
    %10 = vector.shape_cast %9 : vector<1x4x128xf32> to vector<4x128xf32>
    %11 = vector.shape_cast %8 : vector<4x128xf32> to vector<1x4x128xf32>
    tpu.vector_store %arg3[%c0_4, %c0_5, %c0_6], %11 {strides = array<i32>} : memref<1x4x128xf32, #tpu.memory_space<vmem>>, vector<1x4x128xf32>,
    return
  }
  func.func @transform_0(%arg0: i32) -> (i32, i32, i32) {
    %c0_i32 = arith.constant 0 : i32
    %c0_i32_0 = arith.constant 0 : i32
    %c0_i32_1 = arith.constant 0 : i32
    return %arg0, %c0_i32, %c0_i32_0 : i32, i32, i32
  }
  func.func @transform_1(%arg0: i32) -> (i32, i32) {
    %c0_i32 = arith.constant 0 : i32
    %c0_i32_0 = arith.constant 0 : i32
    %c0_i32_1 = arith.constant 0 : i32
    return %c0_i32, %c0_i32_0 : i32, i32
  }
  func.func @transform_2(%arg0: i32) -> (i32, i32, i32) {
    %c0_i32 = arith.constant 0 : i32
    %c0_i32_0 = arith.constant 0 : i32
    %c0_i32_1 = arith.constant 0 : i32
    return %arg0, %c0_i32, %c0_i32_0 : i32, i32, i32
  }
}

</mosaic_0001>

<bundles_post_ra>
// kernel: tpu_custom_call.1
= control target key start
LH: loop header
LB: loop body
LE: loop exit
PB: predicated region body
PF: predicated region fallthrough
CT: control target
= control target key end

     0   :  { %7 = vsyncpa [#allocation3], 0  ;;  %s785_s0 = inlined_call_operand.hbm [shape: f32[2,4,128], index: 0, kind: input, shape index: {}]   ;;  %s786_s1 = inlined_call_operand.hbm [shape: f32[4,20], index: 1, kind: input, shape index: {}]   ;;  %s787_s2 = inlined_call_operand.hbm [shape: f32[2,4,128], index: 2, kind: output, shape index: {}]  }
   0x1   :  { %9 = vsyncpa [#allocation3 + $0x1], 0 }
   0x2   :  { %10 = vsyncpa [#allocation6], 0 }
   0x3   :  { %11 = vsyncpa [#allocation4], 0 }
   0x4   :  { %13 = vsyncpa [#allocation4 + $0x1], 0  ;;  %s603_s9 = smov 0   ;;  %s605_s10 = smov 0  }
   0x5   :  { %s607_s11 = smov 0   ;;  %s609_s12 = smov 0  }
   0x6 LB: > { %s624_s13 = sadd.s32 4294967295, %s577_s12   ;;  %s363_s14 = sadd.s32 4294967294, %s577_s12   ;;  %s577_s12 = sphi %s609_s12, %s810_s12   ;;  %s573_s11 = sphi %s607_s11, %s809_s11   ;;  %s569_s10 = sphi %s605_s10, %s808_s10   ;;  %s565_s9 = sphi %s603_s9, %s807_s9  }
   0x7   : > { %p39_p0 = scmp.ne.s32.totalorder %s569_s10, %s565_s9  ;;  %p788_p1 = scmp.eq.s32.totalorder %s624_s13, 0 }
   0x8   : > { %p90_p3 = scmp.eq.s32.totalorder %s363_s14, 1  ;;  %p364_p5 = scmp.ge.s32.totalorder %s577_s12, 1 }
   0x9   : > { %p633_p4 = por %p788_p1, %p39_p0  ;;  %p97_p7 = scmp.lt.s32.totalorder %s577_s12, 3 }
   0xa   : > { %p638_p6 = por %p90_p3, %p39_p0  ;;  %s579_s18 = smov [#allocation5]  }
   0xb   : > { %s792_s15 = scalar_select %p633_p4, 1, 0 }
   0xc   : > { %s793_s16 = scalar_select %p638_p6, 1, 0 }
   0xd   : > { %p643_p8 = pnand %p364_p5, %p97_p7  ;;  %s110_s19 = sshll.u32 %s579_s18, 4  ;;  %s111_s19 = int_to_ptr.vmem [resolvable:$true] %s110_s19 }
   0xe   : > { %s651_s20 = sadd.s32 1, %s577_s12   ;;  %s26_s24 = sadd.s32 1, %s573_s11 }
   0xf   : > { %s794_s17 = scalar_select %p643_p8, 1, 0 }
  0x10   : > { %p400_p10 = pneg %p643_p8  ;;  %s23_s22 = ssub.s32 %s577_s12, %s651_s20 }
  0x11   : > { %p661_p12 = scmp.eq.s32.totalorder %s23_s22, 0  ;;  %p33_p13 = scmp.ne.s32.totalorder %s573_s11, %s569_s10 }
  0x12   : > { %p655_p11 = pnand %p400_p10, %p788_p1  ;;  %s466_s25 = scalar_lea.vmem %s111_s19, 64 }
  0x13   : > { %p467_p3 = scmp.ne.s32.totalorder %s111_s19, %s466_s25  ;;  %p474_p9 = scmp.lt.s32.totalorder %s111_s19, %s111_s19 }
  0x14   : > { %p457_p0 = pneg %p655_p11  ;;  %p475_p2 = scmp.lt.s32.totalorder %s466_s25, %s466_s25 }
  0x16   : > { %p469_p5 = pnand %p467_p3, %p457_p0  ;;  %p476_p10 = por %p475_p2, %p474_p9 }
  0x18   : > { %p470_p7 = pneg %p469_p5 }
  0x1a   : > { %p477_p1 = pnand %p476_p10, %p470_p7 }
  0x1c   : > { %480 = shalt.err (!%p477_p1)
}
  0x1d   : > { %403 = dma.hbm_to_vmem [thread:$0]  (!%p655_p11), %s786_s1, 64, %s111_s19, [#allocation6]  }
  0x1e   : > { %s678_s28 = scalar_select %p661_p12, %s573_s11, %s26_s24  }
  0x1f   : > { %p34_p1 = scmp.eq.s32.totalorder %s577_s12, 0  ;;  %p797_p2 = scmp.eq.s32.totalorder %s624_s13, 1 }
  0x20   : > { %p413_p0 = scmp.lt.s32.totalorder %s577_s12, 2  ;;  %s121_s30 = sand.u32 1, %s573_s11  }
  0x21   : > { %p686_p9 = por %p797_p2, %p33_p13  ;;  %p35_p3 = por %p34_p1, %p33_p13 }
  0x22   : > { %s367_s3 = sshll.u32 %s121_s30, 2  ;;  %s368_s4 = sshll.u32 %s577_s12, 6 }
  0x23   : > { %s798_s29 = scalar_select %p686_p9, 1, 0 }
  0x24   : > { %s699_s7 = scalar_lea.hbm %s785_s0, %s368_s4  ;;  %s125_s8 = scalar_lea.vmem [#allocation2], %s367_s3 }
  0x25   : > { %s132_s14 = sshll.u32 %s125_s8, 4  ;;  %p701_p11 = pnand %p413_p0, %p35_p3  ;;  %s133_s14 = int_to_ptr.vmem [resolvable:$true] %s132_s14 }
  0x26   : > { %s122_s19 = scalar_lea.sflag [#allocation3], %s121_s30  ;;  %s481_s21 = scalar_lea.hbm %s699_s7, 64 }
  0x27   : > { %p482_p12 = scmp.ne.s32.totalorder %s699_s7, %s481_s21  ;;  %p483_p13 = pneg %p701_p11 }
  0x28   : > { %s486_s24 = scalar_lea.hbm %s785_s0, 128  ;;  %p487_p10 = scmp.lt.s32.totalorder %s699_s7, %s785_s0 }
  0x29   : > { %p484_p5 = pnand %p483_p13, %p482_p12  ;;  %p488_p1 = scmp.lt.s32.totalorder %s486_s24, %s481_s21 }
  0x2b   : > { %p485_p7 = pneg %p484_p5  ;;  %p489_p2 = por %p488_p1, %p487_p10 }
  0x2d   : > { %p490_p0 = pnand %p489_p2, %p485_p7 }
  0x2f   : > { %493 = shalt.err (!%p490_p0)
}
  0x30   : > { %s494_s27 = scalar_lea.vmem %s133_s14, 64  ;;  %s580_s30 = smov [#allocation2]  }
  0x31   : > { %p495_p3 = scmp.ne.s32.totalorder %s133_s14, %s494_s27  ;;  %s499_s3 = sshll.u32 %s580_s30, 4  ;;  %s500_s3 = int_to_ptr.vmem [resolvable:$false] %s499_s3 }
  0x32   : > { %s501_s4 = scalar_lea.vmem %s500_s3, 128  ;;  %p502_p12 = scmp.lt.s32.totalorder %s133_s14, %s500_s3 }
  0x33   : > { %p497_p6 = pnand %p495_p3, %p483_p13  ;;  %p503_p5 = scmp.lt.s32.totalorder %s501_s4, %s494_s27 }
  0x35   : > { %p498_p9 = pneg %p497_p6  ;;  %p504_p4 = por %p503_p5, %p502_p12 }
  0x37   : > { %p505_p8 = pnand %p504_p4, %p498_p9 }
  0x39   : > { %508 = shalt.err (!%p505_p8)
}
  0x3a   : > { %407 = dma.hbm_to_vmem [thread:$0]  (!%p701_p11), %s699_s7, 64, %s133_s14, %s122_s19  }
  0x3b   : > { %p800_p7 = scmp.ne.s32.totalorder %s794_s17, 0 }
  0x3c   : > { %s722_s5 = sand.u32 (!%p800_p7), 1, %s569_s10   ;;  %p801_p4 = scmp.ne.s32.totalorder (!%p800_p7), %s792_s15, 0 }
  0x3d   : > { %141 = sbr.rel (%p800_p7) target bundleno = 403 (0x193), region = 28  ;;  %s370_s6 = sshll.u32 (!%p800_p7), %s722_s5, 2 }
  0x3e   : > { %s144_s8 = scalar_lea.sflag (!%p800_p7), [#allocation3], %s722_s5  ;;  %s147_s21 = scalar_lea.vmem (!%p800_p7), [#allocation2], %s370_s6 }
  0x42   : > { %552 = dma.done.wait (%p801_p4), %s144_s8, 64  }
  0x43   : > { %554 = vsyncadd (%p801_p4), %s144_s8, 4294967232  ;;  %p802_p6 = scmp.eq.s32.totalorder %s624_s13, 0 }
  0x45   : > { %556 = dma.done.wait (%p802_p6), [#allocation6], 64   ;;  %p803_p8 = pmov %p802_p6 }
  0x46   : > { %v581_v0 = vmov 0.0   ;;  %vm582_vm0 = vmmov 0   ;;  %v173_v1 = vld [vmem:[%s147_s21] sm:$0xf]  ;;  %s583_s17 = smov 127   ;;  %s584_s7 = smov 1  }
  0x47   : > { %558 = vsyncadd (%p803_p8), [#allocation6], 4294967232  ;;  %383 = vmatprep.subr.mxu0 %v581_v0  ;;  %389 = vmatprep.mubr.msk.f32.mxu0 %vm582_vm0, %v581_v0  ;;  %s585_s14 = smov 126   ;;  %s586_s18 = smov 2   ;;  %vm188_vm1 = vcmask 1043456   ;;  %vm191_vm2 = vcmask 162816  }
  0x48   : > { %178 = vrot.lane.b32.xlu0 %v173_v1, %s583_s17  ;;  %176 = vrot.lane.b32.xlu1 %v173_v1, %s584_s7  ;;  %v172_v9 = vld [vmem:[#allocation5] sm:$0xf]  ;;  %s171_s15 = scalar_lea.vmem [#allocation7], %s370_s6  ;;  %s376_s22 = sshll.u32 %s624_s13, 6 }
  0x49   : > { %s283_s19 = sshll.u32 %s171_s15, 4  ;;  %s744_s25 = scalar_lea.hbm %s787_s2, %s376_s22  ;;  %s739_s19 = int_to_ptr.vmem [resolvable:$true] %s283_s19 }
  0x4a   : > { %s270_s26 = scalar_lea.sflag [#allocation4], %s722_s5  ;;  %s509_s27 = scalar_lea.vmem %s739_s19, 64 }
  0x4b   : > { %p510_p9 = scmp.ne.s32.totalorder %s739_s19, %s509_s27  ;;  %p804_p11 = scmp.ne.s32.totalorder %s798_s29, 0 }
  0x4c   : > { %180 = vrot.lane.b32.xlu0 %v173_v1, %s585_s14  ;;  %174 = vrot.lane.b32.xlu1 %v173_v1, %s586_s18  ;;  %s587_s13 = smov [#allocation7]  }
  0x4d   : > { %p511_p13 = pnand %p510_p9, %p804_p11  ;;  %s513_s30 = sshll.u32 %s587_s13, 4  ;;  %s514_s30 = int_to_ptr.vmem [resolvable:$false] %s513_s30 }
  0x4e   : > { %s515_s3 = scalar_lea.vmem %s514_s30, 128  ;;  %p516_p1 = scmp.lt.s32.totalorder %s739_s19, %s514_s30 }
  0x4f   : > { %p512_p10 = pneg %p511_p13  ;;  %p517_p2 = scmp.lt.s32.totalorder %s515_s3, %s509_s27 }
  0x51   : > { %p518_p0 = por %p517_p2, %p516_p1 }
  0x53   : > { %p519_p3 = pnand %p518_p0, %p512_p10 }
  0xba   : > { %v179_v2 = vpop.permute.xlu0 %178  ;;  %v177_v3 = vpop.permute.xlu1 %176 }
  0xbb   : > { %v186_v4 = vrot.slane %v179_v2, 4  ;;  %v183_v5 = vrot.slane %v177_v3, 4 }
  0xbd   : > { %v190_v8 = vsel %vm188_vm1, %v173_v1, %v186_v4 }
  0xbe   : > { %v181_v6 = vpop.permute.xlu0 %180  ;;  %v175_v7 = vpop.permute.xlu1 %174 }
  0xbf   : > { %384 = vmatpush3.msk.msra.mxu0 %vm188_vm1, %v181_v6  ;;  %v189_v10 = vsel %vm188_vm1, %v175_v7, %v183_v5 }
  0xc0   : > { %385 = vmatprep.subr.mxu0 %v581_v0 }
  0xc1   : > { %386 = vmatpush3.msra.mxu0 %v190_v8 }
  0xc2   : > { %387 = vmatprep.subr.mxu0 %v581_v0 }
  0xc3   : > { %388 = vmatpush3.msra.mxu0 %v189_v10 }
  0xc4   : > { %390 = vmatmul.mubr.msk.f32.vlgmr.msra.gmra.mxu0 %vm191_vm2, %v172_v9 }
 0x184   : > { %v264_v11 = vpop.f32.mrf.mxu0 }
 0x185   : > { %268 = vst [vmem:[%s171_s15] sm:$0xf] %v264_v11 }
 0x186   : > { %v391_v12 = vpop.f32.mrf.mxu0 }
 0x187   : > { %522 = shalt.err (!%p519_p3)
}
 0x188   : > { %s523_s4 = scalar_lea.hbm %s744_s25, 64  ;;  %s527_s8 = scalar_lea.hbm %s787_s2, 128 }
 0x189   : > { %p524_p12 = scmp.ne.s32.totalorder %s744_s25, %s523_s4  ;;  %p528_p4 = scmp.lt.s32.totalorder %s744_s25, %s787_s2 }
 0x18a   : > { %p529_p6 = scmp.lt.s32.totalorder %s527_s8, %s523_s4 }
 0x18b   : > { %p525_p5 = pnand %p524_p12, %p804_p11 }
 0x18c   : > { %p530_p8 = por %p529_p6, %p528_p4 }
 0x18d   : > { %p526_p7 = pneg %p525_p5 }
 0x18f   : > { %p531_p9 = pnand %p530_p8, %p526_p7 }
 0x191   : > { %534 = shalt.err (!%p531_p9)
}
 0x192   : > { %398 = dma.vmem_to_hbm [thread:$0]  (%p804_p11), %s739_s19, 64, %s744_s25, %s270_s26  }
 0x193 PF: > { %s295_s7 = sand.u32 1, %s565_s9   ;;  %p805_p13 = scmp.ne.s32.totalorder %s793_s16, 0 }
 0x194   : > { %p806_p10 = scmp.ge.s32.totalorder %s577_s12, 2  ;;  %s296_s14 = scalar_lea.sflag [#allocation4], %s295_s7 }
 0x196   : > { %p409_p1 = pnand %p806_p10, %p805_p13 }
 0x198   : > { %p410_p2 = pneg %p409_p1 }
 0x19a   : > { %560 = dma.done.wait (%p410_p2), %s296_s14, 64  }
 0x19b   : > { %562 = vsyncadd (%p410_p2), %s296_s14, 4294967232  ;;  %p16_p0 = scmp.ge.s32.totalorder %s651_s20, 4   ;;  %s807_s9 = smov %s569_s10 }
 0x19c   : > { %s808_s10 = smov %s573_s11  ;;  %s809_s11 = smov %s678_s28 }
 0x19d   : > { %s810_s12 = smov %s651_s20  ;;  %18 = sbr.rel (!%p16_p0) target bundleno = 6 (0x6), region = 77 }
 0x1a2   :  { %301 = vsyncpa [#allocation3], 1 }
 0x1a3   :  { %303 = vsyncpa [#allocation3 + $0x1], 1 }
 0x1a4   :  { %304 = vsyncpa [#allocation6], 1 }
 0x1a5   :  { %305 = vsyncpa [#allocation4], 1 }
 0x1a6   :  { %307 = vsyncpa [#allocation4 + $0x1], 1 }

</bundles_post_ra>
